<compile_context>
chip_gen: v7x
topology: tpu7x:2x2x1
jax: 0.10.0
libtpu: 0.0.40
codegen_flags: <defaults>
</compile_context>

<pallas_src>
import functools

import jax
import jax.numpy as jnp
from jax import lax
from jax.experimental import pallas as pl
from jax.experimental.pallas import tpu as pltpu

_MAX_LANES = 1024                    # widest lane-dense slab we consider
_TARGET_BLOCK_ELEMS = 2048 * 512     # ~4 MiB per f32 block
_MAX_BLK_ROWS = 4096


# ----------------------------------------------------------------------------
# Kernels
# ----------------------------------------------------------------------------
def _binarize_det_kernel(x_ref, o_ref):
    """T == 0: deterministic (x >= 0) threshold (the dead zone is empty)."""
    o_ref[...] = (x_ref[...] >= 0).astype(o_ref.dtype)


def _apply_threshold(x, rnd, half_t, out_dtype):
    """out = 1 if x >= T/2; rnd if -T/2 <= x < T/2; 0 if x < -T/2."""
    one = jnp.asarray(1.0, out_dtype)
    zero = jnp.asarray(0.0, out_dtype)
    half = jnp.asarray(half_t, x.dtype)
    neg_half = jnp.asarray(-half_t, x.dtype)
    if half_t >= 0.0:
        # Select form: equivalent to the reference formula for T >= 0.
        return jnp.where(x >= half, one, jnp.where(x < neg_half, zero, rnd))
    # Exact reference formula for the degenerate T < 0 case.
    ones = jnp.where(x >= half, one, zero)
    maks = (jnp.where(x < half, one, zero)
            - jnp.where(x < neg_half, one, zero))
    return ones + maks * rnd


def _binarize_stoch_prng_kernel(seed_ref, x_ref, o_ref, *, half_t):
    """T != 0 path using the TPU hardware PRNG (mem-bound)."""
    pltpu.prng_seed(seed_ref[0], pl.program_id(0))
    bits = pltpu.prng_random_bits(x_ref.shape)
    rnd = (bits & 1).astype(o_ref.dtype)
    o_ref[...] = _apply_threshold(x_ref[...], rnd, half_t, o_ref.dtype)


def _binarize_stoch_hash_kernel(seed_ref, x_ref, o_ref, *, half_t,
                                blk_rows, lanes):
    """Fallback (non-TPU / interpret): counter-hash RNG, trimmed VALU cost."""
    shape = x_ref.shape
    row = lax.broadcasted_iota(jnp.int32, shape, 0)
    col = lax.broadcasted_iota(jnp.int32, shape, 1)
    base = pl.program_id(0) * jnp.int32(blk_rows * lanes)   # hoisted scalar
    ctr = (row * jnp.int32(lanes) + col + base).astype(jnp.uint32)
    seed_u = seed_ref[0].astype(jnp.uint32) * jnp.uint32(0x9E3779B9)
    h = (ctr ^ (ctr >> 16)) * jnp.uint32(0x85EBCA6B)
    h = h ^ seed_u                       # seed separation after first round
    h = h ^ (h >> 13)
    rnd = (h & jnp.uint32(1)).astype(o_ref.dtype)
    o_ref[...] = _apply_threshold(x_ref[...], rnd, half_t, o_ref.dtype)


# ----------------------------------------------------------------------------
# Wrapper
# ----------------------------------------------------------------------------
def _choose_lanes(total):
    """Largest multiple of 128 (<=1024) dividing `total`; prefer rows % 8 == 0.

    Returns (lanes, needs_pad)."""
    best = None
    for lanes in range(_MAX_LANES, 0, -128):
        if total % lanes == 0:
            if best is None:
                best = lanes
            if (total // lanes) % 8 == 0:
                return lanes, False
    if best is not None:
        return best, False
    return 128, True


def binarize01_act(x, T=0.0, seed=0):
    """Pallas implementation of Binarize01Act.forward for a plain tensor."""
    orig_shape = x.shape
    total = int(x.size)
    if total == 0:
        return x

    lanes, needs_pad = _choose_lanes(total)
    flat = x.reshape(-1)
    if needs_pad:
        padded_total = -(-total // lanes) * lanes
        flat = jnp.pad(flat, (0, padded_total - total))
    else:
        padded_total = total
    rows = padded_total // lanes
    x2d = flat.reshape(rows, lanes)

    # Block rows: ~4 MiB f32 blocks, capped; guarantee >= 2 grid steps when
    # there is enough work so both v7x TensorCores are used.
    target_rows = min(_MAX_BLK_ROWS,
                      max(8, (_TARGET_BLOCK_ELEMS // lanes) // 8 * 8))
    if rows <= target_rows:
        if rows >= 16:
            blk_rows = -(-((rows + 1) // 2) // 8) * 8   # split into >=2 blocks
        else:
            blk_rows = rows                             # tiny: one full block
    else:
        blk_rows = target_rows
    grid = (pl.cdiv(rows, blk_rows),)

    block_bytes = blk_rows * lanes * x.dtype.itemsize
    vmem_limit = int(min(48 << 20, max(32 << 20, 10 * block_bytes)))
    cparams = pltpu.CompilerParams(
        dimension_semantics=("parallel",),
        vmem_limit_bytes=vmem_limit)

    half_t = float(T) / 2.0
    out_shape = jax.ShapeDtypeStruct((rows, lanes), x.dtype)

    if half_t == 0.0:
        out2d = pl.pallas_call(
            _binarize_det_kernel,
            out_shape=out_shape,
            grid_spec=pltpu.PrefetchScalarGridSpec(
                num_scalar_prefetch=0,
                grid=grid,
                in_specs=[pl.BlockSpec((blk_rows, lanes), lambda i: (i, 0))],
                out_specs=pl.BlockSpec((blk_rows, lanes), lambda i: (i, 0)),
            ),
            compiler_params=cparams,
        )(x2d)
    else:
        use_hw_prng = jax.default_backend() == "tpu"
        if use_hw_prng:
            kernel = functools.partial(_binarize_stoch_prng_kernel,
                                       half_t=half_t)
        else:
            kernel = functools.partial(_binarize_stoch_hash_kernel,
                                       half_t=half_t,
                                       blk_rows=blk_rows, lanes=lanes)
        seed_arr = jnp.asarray([seed], dtype=jnp.int32)
        out2d = pl.pallas_call(
            kernel,
            out_shape=out_shape,
            grid_spec=pltpu.PrefetchScalarGridSpec(
                num_scalar_prefetch=1,          # seed lives in SMEM
                grid=grid,
                in_specs=[pl.BlockSpec((blk_rows, lanes),
                                       lambda i, seed_ref: (i, 0))],
                out_specs=pl.BlockSpec((blk_rows, lanes),
                                       lambda i, seed_ref: (i, 0)),
            ),
            compiler_params=cparams,
        )(seed_arr, x2d)

    out_flat = out2d.reshape(-1)
    if needs_pad:
        out_flat = out_flat[:total]
    return out_flat.reshape(orig_shape)


if __name__ == "__main__":
    key = jax.random.PRNGKey(0)
    # Small NCHW input consistent with a conv feature map.
    x = jax.random.normal(key, (2, 4, 16, 16), dtype=jnp.float32)

    # Module default: T=0 -> deterministic (x >= 0) binarization.
    out = jax.block_until_ready(binarize01_act(x, T=0.0, seed=0))
    ref = (x >= 0.0).astype(jnp.float32)
    assert out.shape == x.shape and out.dtype == x.dtype
    assert bool(jnp.all(out == ref))

    # Stochastic dead-zone path (T > 0): values must be in {0, 1}, and
    # outside the dead zone they must match the threshold.
    T = 1.0
    out_t = jax.block_until_ready(binarize01_act(x, T=T, seed=123))
    assert out_t.shape == x.shape and out_t.dtype == x.dtype
    assert bool(jnp.all((out_t == 0.0) | (out_t == 1.0)))
    assert bool(jnp.all(jnp.where(x >= T / 2, out_t == 1.0, True)))
    assert bool(jnp.all(jnp.where(x < -T / 2, out_t == 0.0, True)))

    # Non-128-divisible size exercises the minimal-pad fallback path.
    x2 = jax.random.normal(jax.random.PRNGKey(1), (3, 5, 7), dtype=jnp.float32)
    out2 = jax.block_until_ready(binarize01_act(x2, T=0.0))
    assert out2.shape == x2.shape
    assert bool(jnp.all(out2 == (x2 >= 0.0).astype(jnp.float32)))

    print("KERNEL_OK")
</pallas_src>

<mosaic_0001>
module attributes {stable_mosaic.version = 11 : i64} {
  func.func @_binarize_det_kernel(%arg0: i32, %arg1: memref<8x256xf32, #tpu.memory_space<vmem>>, %arg2: memref<8x256xf32, #tpu.memory_space<vmem>>) attributes {dimension_semantics = [#tpu.dimension_semantics<parallel>], iteration_bounds = array<i64: 1>, scalar_prefetch = 0 : i64, scratch_operands = 0 : i64, tpu.core_type = #tpu.core_type<tc>, window_params = [{transform_indices = @transform_0, window_bounds = array<i64: 8, 256>}, {transform_indices = @transform_1, window_bounds = array<i64: 8, 256>}]} {
    %c0 = arith.constant 0 : index
    %c0_0 = arith.constant 0 : index
    %0 = vector.load %arg1[%c0, %c0_0] : memref<8x256xf32, #tpu.memory_space<vmem>>, vector<8x256xf32>
    %cst = arith.constant 0.000000e+00 : f32
    %1 = vector.broadcast %cst : f32 to vector<8x256xf32>
    %2 = arith.cmpf oge, %0, %1 : vector<8x256xf32>
    %3 = arith.extui %2 : vector<8x256xi1> to vector<8x256xi32>
    %4 = arith.sitofp %3 : vector<8x256xi32> to vector<8x256xf32>
    %c0_1 = arith.constant 0 : index
    %c0_2 = arith.constant 0 : index
    %5 = vector.load %arg2[%c0_1, %c0_2] : memref<8x256xf32, #tpu.memory_space<vmem>>, vector<8x256xf32>
    tpu.vector_store %arg2[%c0_1, %c0_2], %4 {strides = array<i32>} : memref<8x256xf32, #tpu.memory_space<vmem>>, vector<8x256xf32>,
    return
  }
  func.func @transform_0(%arg0: i32) -> (i32, i32) {
    %c0_i32 = arith.constant 0 : i32
    %c0_i32_0 = arith.constant 0 : i32
    return %arg0, %c0_i32 : i32, i32
  }
  func.func @transform_1(%arg0: i32) -> (i32, i32) {
    %c0_i32 = arith.constant 0 : i32
    %c0_i32_0 = arith.constant 0 : i32
    return %arg0, %c0_i32 : i32, i32
  }
}

</mosaic_0001>

<bundles_post_ra>
// kernel: tpu_custom_call.1
= control target key start
LH: loop header
LB: loop body
LE: loop exit
PB: predicated region body
PF: predicated region fallthrough
CT: control target
= control target key end

     0   :  { %6 = vsyncpa [#allocation3], 0  ;;  %s136_s0 = inlined_call_operand.hbm [shape: f32[8,256], index: 0, kind: input, shape index: {}]   ;;  %s137_s1 = inlined_call_operand.hbm [shape: f32[8,256], index: 1, kind: output, shape index: {}]  }
   0x1   :  { %7 = vsyncpa [#allocation4], 0  ;;  %s99_s6 = smov [#allocation2]   ;;  %s51_s10 = scalar_lea.hbm %s136_s0, 256 }
   0x2   :  { %s14_s7 = sshll.u32 %s99_s6, 4  ;;  %p52_p0 = scmp.ne.s32.totalorder %s136_s0, %s51_s10  ;;  %s15_s7 = int_to_ptr.vmem [resolvable:$true] %s14_s7 }
   0x3   :  { %p55_p1 = scmp.lt.u32.totalorder %s51_s10, %s136_s0 }
   0x5   :  { %p57_p2 = pnand %p55_p1, %p52_p0 }
   0x7   :  { %60 = shalt.err (!%p57_p2)
}
   0x8   :  { %s61_s15 = scalar_lea.vmem %s15_s7, 256  ;;  %p66_p4 = scmp.lt.s32.totalorder %s15_s7, %s15_s7 }
   0x9   :  { %p62_p3 = scmp.ne.s32.totalorder %s15_s7, %s61_s15  ;;  %p67_p5 = scmp.lt.s32.totalorder %s61_s15, %s61_s15 }
   0xb   :  { %p68_p6 = por %p67_p5, %p66_p4 }
   0xd   :  { %p69_p7 = pnand %p68_p6, %p62_p3 }
   0xf   :  { %72 = shalt.err (!%p69_p7)
}
  0x10   :  { %17 = dma.hbm_to_vmem [thread:$0]  %s136_s0, 256, %s15_s7, [#allocation3]  }
  0x11   :  { %95 = dma.done.wait [#allocation3], 256  }
  0x12   :  { %96 = vsyncadd [#allocation3], 4294967040  ;;  %s100_s18 = smov [#allocation5]   ;;  %v21_v0 = vld [vmem:[#allocation2] sm:$0xff]  ;;  %v22_v1 = vld [vmem:[#allocation2 + $0x8] sm:$0xff]  ;;  %v101_v2 = vmov 0.0  }
  0x13   :  { %s37_s19 = sshll.u32 %s100_s18, 4  ;;  %vm23_vm0 = vcmp.ge.f32.partialorder %v21_v0, 0.0  ;;  %vm24_vm1 = vcmp.ge.f32.partialorder %v22_v1, 0.0  ;;  %s38_s19 = int_to_ptr.vmem [resolvable:$true] %s37_s19 }
  0x14   :  { %v46_v3 = vsel %vm23_vm0, 1.0, %v101_v2  ;;  %v47_v4 = vsel %vm24_vm1, 1.0, %v101_v2  ;;  %s73_s20 = scalar_lea.vmem %s38_s19, 256  ;;  %p78_p9 = scmp.lt.s32.totalorder %s38_s19, %s38_s19 }
  0x15   :  { %29 = vst [vmem:[#allocation5] sm:$0xff] %v46_v3  ;;  %30 = vst [vmem:[#allocation5 + $0x8] sm:$0xff] %v47_v4  ;;  %p74_p8 = scmp.ne.s32.totalorder %s38_s19, %s73_s20  ;;  %p79_p10 = scmp.lt.s32.totalorder %s73_s20, %s73_s20 }
  0x17   :  { %p80_p11 = por %p79_p10, %p78_p9 }
  0x19   :  { %p81_p12 = pnand %p80_p11, %p74_p8 }
  0x1b   :  { %84 = shalt.err (!%p81_p12)
}
  0x1c   :  { %s85_s22 = scalar_lea.hbm %s137_s1, 256 }
  0x1d   :  { %p86_p13 = scmp.ne.s32.totalorder %s137_s1, %s85_s22  ;;  %p89_p0 = scmp.lt.u32.totalorder %s85_s22, %s137_s1 }
  0x1f   :  { %p91_p1 = pnand %p89_p0, %p86_p13 }
  0x21   :  { %94 = shalt.err (!%p91_p1)
}
  0x22   :  { %40 = dma.vmem_to_hbm [thread:$0]  %s38_s19, 256, %s137_s1, [#allocation4]  }
  0x23   :  { %97 = dma.done.wait [#allocation4], 256  }
  0x24   :  { %98 = vsyncadd [#allocation4], 4294967040 }
  0x25   :  { %44 = vsyncpa [#allocation3], 1 }
  0x26   :  { %45 = vsyncpa [#allocation4], 1 }

</bundles_post_ra>
